<compile_context>
chip_gen: v5e
topology: v5e:2x2
jax: 0.10.0
libtpu: 0.0.40
codegen_flags: <defaults>
</compile_context>

<pallas_src>
import functools

import jax
import jax.numpy as jnp
from jax import lax
from jax.experimental import pallas as pl
from jax.experimental.pallas import tpu as pltpu


# ---------------------------------------------------------------------------
# pltpu.roll direction probe (done once). The kernel needs
# rolled[p] == y[(p + s) % n]; probe the installed rotate convention so the
# tap shifts are computed with the right sign.
_ROLL_MATCHES_NUMPY = None


def _roll_matches_numpy():
    global _ROLL_MATCHES_NUMPY
    if _ROLL_MATCHES_NUMPY is None:
        def probe(x_ref, o_ref):
            o_ref[...] = pltpu.roll(x_ref[...], shift=1, axis=1)

        x = jnp.arange(128, dtype=jnp.float32).reshape(1, 128)
        y = pl.pallas_call(
            probe, out_shape=jax.ShapeDtypeStruct((1, 128), jnp.float32))(x)
        # jnp.roll convention: element 0 moves to index 1.
        _ROLL_MATCHES_NUMPY = bool(jax.device_get(y[0, 1]) == 0.0)
    return _ROLL_MATCHES_NUMPY


# ---------------------------------------------------------------------------
def _rk4_odeblock_kernel(dt_ref, x_ref, w_ref, b_ref, tmap_ref, o_ref, *,
                         H, W, roll_like_numpy):
    """One rk4 (3/8-rule) step of size dt for one image.

    dt_ref   : VMEM (1, 1)     dt = alpha
    x_ref    : VMEM (C, H*W)   y0; channels on sublanes, pixels on lanes
    w_ref    : VMEM (C, 9*C)   conv weight (tap-major, in-chan minor), sign folded
    b_ref    : VMEM (C, 1)     conv bias (sign folded)
    tmap_ref : VMEM (C, H*W)   per-pixel sum of valid time-channel taps (sign folded)
    o_ref    : VMEM (C, H*W)   y(alpha)
    """
    C, HW = x_ref.shape

    # per-pixel (h, w) coordinates on the lane axis — computed once, reused by
    # all four f-evals.
    p = lax.broadcasted_iota(jnp.int32, (1, HW), 1)
    hh = p // W
    ww = p % W

    # 9 conv taps (dy, dx) in row-major (ky, kx) order, matching w_ref columns.
    # Each tap = lane roll by dy*W + dx plus a mask zeroing pixels whose source
    # (h+dy, w+dx) falls outside the image (== the conv zero padding).
    taps = []
    for ky in range(3):
        for kx in range(3):
            dy, dx = ky - 1, kx - 1
            if dy == 0 and dx == 0:
                taps.append((0, None))            # center tap: identity
                continue
            conds = []
            if dy == -1:
                conds.append(hh >= 1)
            if dy == 1:
                conds.append(hh <= H - 2)
            if dx == -1:
                conds.append(ww >= 1)
            if dx == 1:
                conds.append(ww <= W - 2)
            mask = conds[0]
            for c in conds[1:]:
                mask = jnp.logical_and(mask, c)
            s = dy * W + dx
            shift = ((-s) if roll_like_numpy else s) % HW
            taps.append((shift, mask))

    w_flat = w_ref[...]            # (C, 9C)
    bias = b_ref[...]              # (C, 1), broadcasts over lanes
    tmap = tmap_ref[...]           # (C, HW)

    def f(y, t):
        # im2col: 9 rolled + masked copies of y stacked on sublanes -> (9C, HW)
        cols = []
        for shift, mask in taps:
            if mask is None:
                cols.append(y)
            else:
                cols.append(
                    jnp.where(mask, pltpu.roll(y, shift=shift, axis=1), 0.0))
        patches = jnp.concatenate(cols, axis=0)
        out = jnp.dot(w_flat, patches,
                      preferred_element_type=jnp.float32) + bias
        if t is not None:                         # analytic time-channel term
            out = out + t * tmap
        return out

    y0 = x_ref[...]
    dt = dt_ref[...]                              # (1, 1), broadcasts
    third = jnp.float32(1.0 / 3.0)

    # torchdiffeq rk4_alt_step_func (3/8 rule), t0 = 0, single step of size dt.
    # Output sum accumulated progressively to limit live buffers.
    k1 = f(y0, None)                              # t = 0 -> time term vanishes
    acc = k1
    k2 = f(y0 + (dt * third) * k1, dt * third)
    acc = acc + 3.0 * k2
    k3 = f(y0 + dt * (k2 - third * k1), dt * (2.0 * third))
    acc = acc + 3.0 * k3
    k4 = f(y0 + dt * (k1 - k2 + k3), dt)
    acc = acc + k4
    o_ref[...] = (y0 + acc * (dt * 0.125)).astype(o_ref.dtype)


# ---------------------------------------------------------------------------
def odeblock_forward(x_nchw, weight_oihw, bias, alpha=3.0, sign=1.0):
    """ODEBlock.forward(x, alpha, sign) with a ConcatConv2d(3x3) odefunc.

    x_nchw: (B, C, H, W) f32. weight_oihw: (C, C+1, 3, 3) OIHW, time channel
    is the LAST input channel. bias: (C,).
    """
    B, C, H, W = x_nchw.shape
    HW = H * W
    assert C % 8 == 0, "C must be a multiple of 8 (sublane tile) for (C, H*W) blocking"

    sgn = jnp.float32(sign)
    w = weight_oihw.astype(jnp.float32) * sgn          # fold sign into f
    b = bias.astype(jnp.float32) * sgn

    # Flattened conv weight for the fused im2col matmul: (C_out, 9*C_in),
    # column order = tap-major ((ky,kx) row-major), input-channel minor.
    w_flat = jnp.transpose(w[:, :C, :, :], (0, 2, 3, 1)).reshape(C, 9 * C)

    # Analytic time-channel map: per-pixel sum of the time-channel taps that
    # fall inside the image (zero padding outside) == conv of a ones image
    # with the time-channel weights. Exact at borders/corners.
    w_time_hwio = jnp.transpose(w[:, C, :, :], (1, 2, 0))[:, :, None, :]  # (3,3,1,C)
    tmap = lax.conv_general_dilated(
        jnp.ones((1, H, W, 1), jnp.float32), w_time_hwio, (1, 1), 'SAME',
        dimension_numbers=('NHWC', 'HWIO', 'NHWC'))[0]                    # (H,W,C)
    tmap = jnp.transpose(tmap, (2, 0, 1)).reshape(C, HW)                  # (C,HW)

    x2 = x_nchw.astype(jnp.float32).reshape(B * C, HW)
    b_col = b.reshape(C, 1)
    dt = jnp.full((1, 1), alpha, jnp.float32)

    kernel = functools.partial(_rk4_odeblock_kernel, H=H, W=W,
                               roll_like_numpy=_roll_matches_numpy())

    out = pl.pallas_call(
        kernel,
        out_shape=jax.ShapeDtypeStruct((B * C, HW), jnp.float32),
        grid=(B,),
        in_specs=[
            pl.BlockSpec((1, 1), lambda i: (0, 0)),        # dt
            pl.BlockSpec((C, HW), lambda i: (i, 0)),       # one image per step
            pl.BlockSpec((C, 9 * C), lambda i: (0, 0)),    # flattened weight
            pl.BlockSpec((C, 1), lambda i: (0, 0)),        # bias
            pl.BlockSpec((C, HW), lambda i: (0, 0)),       # time-channel map
        ],
        out_specs=pl.BlockSpec((C, HW), lambda i: (i, 0)),
        compiler_params=pltpu.CompilerParams(
            dimension_semantics=("parallel",),             # megacore split on v7x
            vmem_limit_bytes=32 * 1024 * 1024,             # fits v7x's 64 MiB VMEM
        ),
    )(dt, x2, w_flat, b_col, tmap)
    return out.reshape(B, C, H, W)


# ---------------- pure-JAX reference (for correctness check) ----------------
def _odefunc_ref(t, y_nhwc, w_hwio, bias, sign):
    B, H, W, C = y_nhwc.shape
    tt = jnp.full((B, H, W, 1), t, jnp.float32)
    inp = jnp.concatenate([y_nhwc, tt], axis=-1)
    out = lax.conv_general_dilated(inp, w_hwio, (1, 1), 'SAME',
                                   dimension_numbers=('NHWC', 'HWIO', 'NHWC'))
    return sign * (out + bias.reshape(1, 1, 1, -1))


def _odeblock_ref(x_nchw, w_oihw, bias, alpha=3.0, sign=1.0):
    x = jnp.transpose(x_nchw, (0, 2, 3, 1)).astype(jnp.float32)
    w = jnp.transpose(w_oihw, (2, 3, 1, 0)).astype(jnp.float32)
    f = lambda t, y: _odefunc_ref(t, y, w, bias, sign)
    dt, t0, third = alpha, 0.0, 1.0 / 3.0
    k1 = f(t0, x)
    k2 = f(t0 + dt * third, x + dt * k1 * third)
    k3 = f(t0 + 2.0 * dt * third, x + dt * (k2 - k1 * third))
    k4 = f(t0 + dt, x + dt * (k1 - k2 + k3))
    y1 = x + (k1 + 3.0 * (k2 + k3) + k4) * dt * 0.125
    return jnp.transpose(y1, (0, 3, 1, 2))


if __name__ == "__main__":
    B, C, H, W = 2, 8, 16, 16
    key = jax.random.PRNGKey(0)
    kx, kw, kb = jax.random.split(key, 3)

    x = jax.random.normal(kx, (B, C, H, W), dtype=jnp.float32)
    # Conv2d(C+1 -> C, kernel 3, padding 1): PyTorch default uniform init bound
    fan_in = (C + 1) * 3 * 3
    bound = 1.0 / (fan_in ** 0.5)
    weight = jax.random.uniform(kw, (C, C + 1, 3, 3), jnp.float32, -bound, bound)
    bias = jax.random.uniform(kb, (C,), jnp.float32, -bound, bound)

    y = odeblock_forward(x, weight, bias, alpha=3.0, sign=1.0)
    y = jax.block_until_ready(y)

    y_ref = _odeblock_ref(x, weight, bias, alpha=3.0, sign=1.0)
    assert y.shape == (B, C, H, W) and y.dtype == jnp.float32
    assert jnp.allclose(y, y_ref, rtol=1e-2, atol=1e-2), (
        float(jnp.max(jnp.abs(y - y_ref))))

    print("KERNEL_OK")
</pallas_src>

<mosaic_0001>
module attributes {stable_mosaic.version = 11 : i64} {
  func.func @probe(%arg0: memref<1x128xf32, #tpu.memory_space<vmem>>, %arg1: memref<1x128xf32, #tpu.memory_space<vmem>>) attributes {dimension_semantics = [], scalar_prefetch = 0 : i64, scratch_operands = 0 : i64, tpu.core_type = #tpu.core_type<tc>} {
    %c0 = arith.constant 0 : index
    %c0_0 = arith.constant 0 : index
    %0 = vector.load %arg0[%c0, %c0_0] : memref<1x128xf32, #tpu.memory_space<vmem>>, vector<1x128xf32>
    %c1_i32 = arith.constant 1 : i32
    %1 = tpu.dynamic_rotate %0 by %c1_i32 dim 1 : vector<1x128xf32>, i32 -> vector<1x128xf32>
    %c0_1 = arith.constant 0 : index
    %c0_2 = arith.constant 0 : index
    %2 = vector.load %arg1[%c0_1, %c0_2] : memref<1x128xf32, #tpu.memory_space<vmem>>, vector<1x128xf32>
    tpu.vector_store %arg1[%c0_1, %c0_2], %1 {strides = array<i32>} : memref<1x128xf32, #tpu.memory_space<vmem>>, vector<1x128xf32>,
    return
  }
}

</mosaic_0001>

<bundles_post_ra>
// kernel: tpu_custom_call.1
= control target key start
LH: loop header
LB: loop body
LE: loop exit
PB: predicated region body
PF: predicated region fallthrough
CT: control target
= control target key end

     0   :  { %6 = vsyncpa [#allocation3], 0  ;;  %s118_s0 = inlined_call_operand.hbm [shape: f32[1,128], index: 0, kind: input, shape index: {}]   ;;  %s119_s1 = inlined_call_operand.hbm [shape: f32[1,128], index: 1, kind: output, shape index: {}]  }
   0x1   :  { %7 = vsyncpa [#allocation4], 0  ;;  %s13_s8 = sshll.u32 %s118_s0, 4  ;;  %s99_s9 = smov [#allocation2]   ;;  %s14_s8 = int_to_ptr.hbm [resolvable:$true] %s13_s8 }
   0x2   :  { %s15_s10 = sshll.u32 %s99_s9, 4  ;;  %s16_s10 = int_to_ptr.vmem [resolvable:$true] %s15_s10 }
   0x3   :  { %18 = dma.hbm_to_vmem [thread:$0]  %s14_s8, 16, %s16_s10, [#allocation3]  }
   0x4   :  { %95 = dma.done.wait [#allocation3], 16  }
   0x5   :  { %96 = vsyncadd [#allocation3], 4294967280  ;;  %v23_v0 = vld [vmem:[#allocation2] sm:$0x1]  ;;  %s100_s11 = smov 1   ;;  %s101_s12 = smov [#allocation5]  }
   0x6   :  { %24 = vrot.lane.b32.xlu0 %v23_v0, %s100_s11  ;;  %s32_s13 = sshll.u32 %s101_s12, 4  ;;  %s34_s16 = sshll.u32 %s119_s1, 4  ;;  %s33_s13 = int_to_ptr.vmem [resolvable:$true] %s32_s13  ;;  %s35_s16 = int_to_ptr.hbm [resolvable:$true] %s34_s16 }
  0x78   :  { %v25_v1 = vpop.permute.xlu0 %24 }
  0x79   :  { %26 = vst [vmem:[#allocation5] sm:$0x1] %v25_v1 }
  0x7a   :  { %37 = dma.vmem_to_hbm [thread:$0]  %s33_s13, 16, %s35_s16, [#allocation4]  }
  0x7b   :  { %97 = dma.done.wait [#allocation4], 16  }
  0x7c   :  { %98 = vsyncadd [#allocation4], 4294967280 }
  0x7d   :  { %42 = vsyncpa [#allocation3], 1 }
  0x7e   :  { %43 = vsyncpa [#allocation4], 1 }

</bundles_post_ra>
